<compile_context>
chip_gen: v7x
topology: tpu7x:2x2x1
jax: 0.10.0
libtpu: 0.0.40
codegen_flags: <defaults>
</compile_context>

<pallas_src>
import math

import jax
import jax.numpy as jnp
from jax.experimental import pallas as pl
from jax.experimental.pallas import tpu as pltpu


# --------------------------------------------------------------------------
# kernel: one lane-dense affine step   out = x_packed @ W_blockdiag + bias
# --------------------------------------------------------------------------
def _affine_kernel(x_ref, w_ref, b_ref, o_ref):
    acc = jnp.dot(x_ref[...], w_ref[...], preferred_element_type=jnp.float32)
    # bias is f32; broadcasting handles the (1, od_p) expand-branch bias and the
    # (tile_p, od_p) tile-branch bias with the same kernel.
    o_ref[...] = (acc + b_ref[...]).astype(o_ref.dtype)


# --------------------------------------------------------------------------
# helpers
# --------------------------------------------------------------------------
def _lcm(a, b):
    return a * b // math.gcd(a, b)


def _pick_pack(x_dim, out_dim, n):
    """Rows packed per lane-row so both the x and out feature widths become
    multiples of 128 lanes (unmasked vld/vst, K=128+ matmul)."""
    if x_dim % 128 == 0 and out_dim % 128 == 0:
        return 1
    for p in (2, 4, 8, 16):
        if (p * x_dim) % 128 == 0 and (p * out_dim) % 128 == 0:
            return p if n % p == 0 else 1
    # TODO(synk): odd feature widths fall back to P=1 (lane-masked stores).
    return 1


def _pick_tile_p(n_p, align, row_bytes, target_bytes=4 * 1024 * 1024):
    """Packed-row tile: `align`-aligned, ~target_bytes of x per block, and >=2
    grid steps when N allows (v7x has 2 TensorCores).  Full extent (always a
    legal block) when the array is small."""
    if align >= n_p:
        return n_p
    t = max(align, (target_bytes // max(row_bytes, 1)) // align * align)
    half = -(-n_p // 2)                       # ceil(n_p / 2)
    half_up = -(-half // align) * align       # rounded up to alignment
    t = min(t, half_up)
    return n_p if t >= n_p else t


# --------------------------------------------------------------------------
# wrapper
# --------------------------------------------------------------------------
def decoder_forward(x, z, wx, wz, b, neg_samples=1,
                    target_block_bytes=4 * 1024 * 1024):
    """Mirrors Decoder.forward exactly (mean over the M latent samples).
    x: (N, x_dim); z: (M, B, z_dim) torch convention; W split into
    wx (x_dim, out_dim), wz (z_dim, out_dim); b (out_dim,)."""
    N, x_dim = x.shape
    z_dim, out_dim = wz.shape
    out_dtype = x.dtype  # TODO(synk): emit bf16 here if downstream tolerates it

    # ---- torch glue, done analytically (never materializes (N, M, ...)) ----
    zt = jnp.transpose(z, (1, 0, 2))                  # (B0, M, z_dim)
    B0 = zt.shape[0]
    zbar = jnp.mean(zt.astype(jnp.float32), axis=1)   # (B0, z_dim), tiny
    # Per-z-batch effective bias: zbar @ Wz + b   (f32, tiny)
    zwz = zbar @ wz.astype(jnp.float32) + b.astype(jnp.float32)[None, :]

    # ---- 128-lane row packing (metadata-only reshape of x) ----
    P = _pick_pack(x_dim, out_dim, N)
    Np, xd_p, od_p = N // P, P * x_dim, P * out_dim
    x_p = x.reshape(Np, xd_p)
    # block-diagonal weight (P copies of Wx), built once, resident in VMEM
    w_blk = jnp.kron(jnp.eye(P, dtype=jnp.float32),
                     wx.astype(jnp.float32)).astype(x.dtype)   # (xd_p, od_p)

    row_bytes = xd_p * x_p.dtype.itemsize

    if B0 == 1:
        # torch `expand` branch: every row sees the same z samples ->
        # a single constant bias row; only x streams through the kernel.
        tile_p = _pick_tile_p(Np, 8, row_bytes, target_block_bytes)
        bias = jnp.tile(zwz, (1, P))                  # (1, od_p) f32
    else:
        # torch `tile` branch: row n uses z batch index n % B0.
        reps = neg_samples + 2
        if B0 * reps != N:
            raise ValueError(
                "Decoder tile branch requires x.shape[0] == z.shape[1] * "
                f"(neg_samples + 2); got x rows {N}, z batch {B0}, "
                f"neg_samples {neg_samples}")
        # Align row tiles to the bias period so ONE resident bias block (loaded
        # once, constant index_map) is valid for every grid step.
        align = _lcm(8, B0 // math.gcd(B0, P))
        tile_p = _pick_tile_p(Np, align, row_bytes, target_block_bytes)
        tile_rows = tile_p * P                        # multiple of B0 by construction
        bias = jnp.tile(zwz, (tile_rows // B0, 1)).reshape(tile_p, od_p)

    grid = (pl.cdiv(Np, tile_p),)

    out_p = pl.pallas_call(
        _affine_kernel,
        out_shape=jax.ShapeDtypeStruct((Np, od_p), out_dtype),
        grid=grid,
        in_specs=[
            pl.BlockSpec((tile_p, xd_p), lambda i: (i, 0)),     # x rows (streamed)
            pl.BlockSpec((xd_p, od_p), lambda i: (0, 0)),       # weight (resident)
            pl.BlockSpec(bias.shape, lambda i: (0, 0)),         # bias   (resident)
        ],
        out_specs=pl.BlockSpec((tile_p, od_p), lambda i: (i, 0)),
        compiler_params=pltpu.CompilerParams(
            dimension_semantics=("parallel",),
            vmem_limit_bytes=48 * 1024 * 1024),
    )(x_p, w_blk, bias)

    return out_p.reshape(N, out_dim)


# --------------------------------------------------------------------------
# pure-JAX reference of the exact torch forward
# --------------------------------------------------------------------------
def decoder_reference(x, z, W, b, neg_samples=1):
    zt = jnp.transpose(z, (1, 0, 2))
    if zt.shape[0] == 1:
        zt = jnp.broadcast_to(zt, (x.shape[0], zt.shape[1], zt.shape[2]))
    else:
        zt = jnp.tile(zt, (neg_samples + 2, 1, 1))
    xe = jnp.broadcast_to(x[:, None, :], (x.shape[0], zt.shape[1], x.shape[1]))
    cat = jnp.concatenate([xe, zt], axis=-1)
    h = cat @ W + b
    return jnp.mean(h, axis=1)


if __name__ == "__main__":
    key = jax.random.PRNGKey(0)
    x_dim, z_dim, out_dim = 32, 32, 32
    N, M = 16, 4

    k1, k2, k3, k4, k5, k6 = jax.random.split(key, 6)

    # Deterministic Linear(x_dim + z_dim, out_dim) params (torch-style uniform).
    fan_in = x_dim + z_dim
    bound = 1.0 / (fan_in ** 0.5)
    W = jax.random.uniform(k3, (fan_in, out_dim), jnp.float32, -bound, bound)
    b = jax.random.uniform(k4, (out_dim,), jnp.float32, -bound, bound)
    wx, wz = W[:x_dim], W[x_dim:]

    # ---- branch 1: z batch == 1  -> torch `expand` path ----
    x1 = jax.random.normal(k1, (N, x_dim), jnp.float32)
    z1 = jax.random.normal(k2, (M, 1, z_dim), jnp.float32)     # (S=M, B=1, zd)
    out1 = jax.block_until_ready(decoder_forward(x1, z1, wx, wz, b))
    ref1 = decoder_reference(x1, z1, W, b)
    assert out1.shape == (N, out_dim)
    assert jnp.allclose(out1, ref1, rtol=2e-2, atol=2e-2), float(
        jnp.max(jnp.abs(out1 - ref1)))

    # ---- branch 2: z batch > 1  -> torch `tile` path ----
    neg_samples = 2
    B0 = 4
    N2 = B0 * (neg_samples + 2)                                # x rows must match
    x2 = jax.random.normal(k5, (N2, x_dim), jnp.float32)
    z2 = jax.random.normal(k6, (M, B0, z_dim), jnp.float32)    # (S=M, B=B0, zd)
    out2 = jax.block_until_ready(
        decoder_forward(x2, z2, wx, wz, b, neg_samples=neg_samples))
    ref2 = decoder_reference(x2, z2, W, b, neg_samples=neg_samples)
    assert out2.shape == (N2, out_dim)
    assert jnp.allclose(out2, ref2, rtol=2e-2, atol=2e-2), float(
        jnp.max(jnp.abs(out2 - ref2)))

    print("KERNEL_OK")
</pallas_src>

<mosaic_0001>
module attributes {stable_mosaic.version = 11 : i64} {
  func.func @_affine_kernel(%arg0: i32, %arg1: memref<4x128xf32, #tpu.memory_space<vmem>>, %arg2: memref<128x128xf32, #tpu.memory_space<vmem>>, %arg3: memref<1x128xf32, #tpu.memory_space<vmem>>, %arg4: memref<4x128xf32, #tpu.memory_space<vmem>>) attributes {dimension_semantics = [#tpu.dimension_semantics<parallel>], iteration_bounds = array<i64: 1>, scalar_prefetch = 0 : i64, scratch_operands = 0 : i64, tpu.core_type = #tpu.core_type<tc>, window_params = [{transform_indices = @transform_0, window_bounds = array<i64: 4, 128>}, {pipeline_mode = #tpu.pipeline_mode<synchronous>, transform_indices = @transform_1, window_bounds = array<i64: 128, 128>}, {pipeline_mode = #tpu.pipeline_mode<synchronous>, transform_indices = @transform_2, window_bounds = array<i64: 1, 128>}, {transform_indices = @transform_3, window_bounds = array<i64: 4, 128>}]} {
    %c0 = arith.constant 0 : index
    %c0_0 = arith.constant 0 : index
    %0 = vector.load %arg1[%c0, %c0_0] : memref<4x128xf32, #tpu.memory_space<vmem>>, vector<4x128xf32>
    %c0_1 = arith.constant 0 : index
    %c0_2 = arith.constant 0 : index
    %1 = vector.load %arg2[%c0_1, %c0_2] : memref<128x128xf32, #tpu.memory_space<vmem>>, vector<128x128xf32>
    %cst = arith.constant dense<0.000000e+00> : vector<4x128xf32>
    %2 = tpu.matmul %0, %1, %cst {dimension_numbers = #tpu.dot_dimension_numbers<[1], [0], [0], [1], [0, 0, 1, 1], [], []>} : vector<4x128xf32>, vector<128x128xf32>, vector<4x128xf32> -> vector<4x128xf32>
    %c0_3 = arith.constant 0 : index
    %c0_4 = arith.constant 0 : index
    %3 = vector.load %arg3[%c0_3, %c0_4] : memref<1x128xf32, #tpu.memory_space<vmem>>, vector<1x128xf32>
    %4 = vector.broadcast %3 : vector<1x128xf32> to vector<4x128xf32>
    %5 = arith.addf %2, %4 : vector<4x128xf32>
    %c0_5 = arith.constant 0 : index
    %c0_6 = arith.constant 0 : index
    %6 = vector.load %arg4[%c0_5, %c0_6] : memref<4x128xf32, #tpu.memory_space<vmem>>, vector<4x128xf32>
    tpu.vector_store %arg4[%c0_5, %c0_6], %5 {strides = array<i32>} : memref<4x128xf32, #tpu.memory_space<vmem>>, vector<4x128xf32>,
    return
  }
  func.func @transform_0(%arg0: i32) -> (i32, i32) {
    %c0_i32 = arith.constant 0 : i32
    %c0_i32_0 = arith.constant 0 : i32
    return %arg0, %c0_i32 : i32, i32
  }
  func.func @transform_1(%arg0: i32) -> (i32, i32) {
    %c0_i32 = arith.constant 0 : i32
    %c0_i32_0 = arith.constant 0 : i32
    %c0_i32_1 = arith.constant 0 : i32
    return %c0_i32, %c0_i32_0 : i32, i32
  }
  func.func @transform_2(%arg0: i32) -> (i32, i32) {
    %c0_i32 = arith.constant 0 : i32
    %c0_i32_0 = arith.constant 0 : i32
    %c0_i32_1 = arith.constant 0 : i32
    return %c0_i32, %c0_i32_0 : i32, i32
  }
  func.func @transform_3(%arg0: i32) -> (i32, i32) {
    %c0_i32 = arith.constant 0 : i32
    %c0_i32_0 = arith.constant 0 : i32
    return %arg0, %c0_i32 : i32, i32
  }
}

</mosaic_0001>

<bundles_post_ra>
// kernel: tpu_custom_call.1
= control target key start
LH: loop header
LB: loop body
LE: loop exit
PB: predicated region body
PF: predicated region fallthrough
CT: control target
= control target key end

     0   :  { %8 = vsyncpa [#allocation3], 0  ;;  %s383_s0 = inlined_call_operand.hbm [shape: f32[4,128], index: 0, kind: input, shape index: {}]   ;;  %s384_s1 = inlined_call_operand.hbm [shape: f32[128,128], index: 1, kind: input, shape index: {}]   ;;  %s385_s2 = inlined_call_operand.vmem [shape: f32[1,128], index: 2, kind: input, shape index: {}]   ;;  %s386_s3 = inlined_call_operand.hbm [shape: f32[4,128], index: 3, kind: output, shape index: {}]  }
   0x1   :  { %9 = vsyncpa [#allocation6], 0 }
   0x2   :  { %10 = vsyncpa [#allocation4], 0  ;;  %s309_s12 = smov [#allocation2]   ;;  %s310_s14 = smov [#allocation5]  }
   0x3   :  { %s17_s13 = sshll.u32 %s309_s12, 4  ;;  %s26_s15 = sshll.u32 %s310_s14, 4  ;;  %s18_s13 = int_to_ptr.vmem [resolvable:$true] %s17_s13  ;;  %s337_s15 = int_to_ptr.vmem [resolvable:$true] %s26_s15 }
   0x4   :  { %s237_s18 = scalar_lea.hbm %s383_s0, 64 }
   0x5   :  { %p238_p0 = scmp.ne.s32.totalorder %s383_s0, %s237_s18  ;;  %p241_p1 = scmp.lt.u32.totalorder %s237_s18, %s383_s0 }
   0x7   :  { %p243_p2 = pnand %p241_p1, %p238_p0 }
   0x9   :  { %246 = shalt.err (!%p243_p2)
}
   0xa   :  { %s247_s23 = scalar_lea.vmem %s18_s13, 64  ;;  %p252_p4 = scmp.lt.s32.totalorder %s18_s13, %s18_s13 }
   0xb   :  { %p248_p3 = scmp.ne.s32.totalorder %s18_s13, %s247_s23  ;;  %p253_p5 = scmp.lt.s32.totalorder %s247_s23, %s247_s23 }
   0xd   :  { %p254_p6 = por %p253_p5, %p252_p4 }
   0xf   :  { %p255_p7 = pnand %p254_p6, %p248_p3 }
  0x11   :  { %258 = shalt.err (!%p255_p7)
}
  0x12   :  { %20 = dma.hbm_to_vmem [thread:$0]  %s383_s0, 64, %s18_s13, [#allocation3]  }
  0x13   :  { %s259_s28 = scalar_lea.hbm %s384_s1, 2048 }
  0x14   :  { %p260_p8 = scmp.ne.s32.totalorder %s384_s1, %s259_s28  ;;  %p263_p9 = scmp.lt.u32.totalorder %s259_s28, %s384_s1 }
  0x16   :  { %p265_p10 = pnand %p263_p9, %p260_p8 }
  0x18   :  { %268 = shalt.err (!%p265_p10)
}
  0x19   :  { %s269_s6 = scalar_lea.vmem %s337_s15, 2048  ;;  %p274_p12 = scmp.lt.s32.totalorder %s337_s15, %s337_s15 }
  0x1a   :  { %p270_p11 = scmp.ne.s32.totalorder %s337_s15, %s269_s6  ;;  %p275_p13 = scmp.lt.s32.totalorder %s269_s6, %s269_s6 }
  0x1c   :  { %p276_p0 = por %p275_p13, %p274_p12 }
  0x1e   :  { %p277_p1 = pnand %p276_p0, %p270_p11 }
  0x20   :  { %280 = shalt.err (!%p277_p1)
}
  0x21   :  { %s311_s0 = smov 128   ;;  %s312_s7 = smov 8  }
  0x22   :  { %32 = dma.hbm_to_vmem [thread:$0]  %s384_s1, 2048, %s337_s15, [#allocation6], %s311_s0, %s311_s0, %s312_s7  }
  0x23   :  { %303 = dma.done.wait [#allocation3], 64  }
  0x24   :  { %304 = vsyncadd [#allocation3], 4294967232 }
  0x25   :  { %305 = dma.done.wait [#allocation6], 2048  }
  0x26   :  { %306 = vsyncadd [#allocation6], 4294965248  ;;  %v313_v0 = vmov 0.0|0.0   ;;  %vm314_vm0 = vmmov 0   ;;  %v315_v1 = vmov 0.0   ;;  %v42_v2 = vld [vmem:[#allocation5] sm:$0xff] }
  0x27   :  { %205 = vmatprep.subr.bf16.mxu0 %v313_v0  ;;  %202 = vmatprep.mubr.msk.f32.mxu0 %vm314_vm0, %v315_v1  ;;  %v43_v3 = vld [vmem:[#allocation5 + $0x8] sm:$0xff]  ;;  %v44_v4 = vld [vmem:[#allocation5 + $0x10] sm:$0xff]  ;;  %v45_v6 = vld [vmem:[#allocation5 + $0x18] sm:$0xff]  ;;  %s316_s11 = smov [#allocation7]  }
  0x28   :  { %v206_v5 = vpack.c.bf16 %v43_v3, %v42_v2  ;;  %v209_v7 = vpack.c.bf16 %v45_v6, %v44_v4  ;;  %v46_v8 = vld [vmem:[#allocation5 + $0x20] sm:$0xff]  ;;  %v47_v9 = vld [vmem:[#allocation5 + $0x28] sm:$0xff]  ;;  %v48_v11 = vld [vmem:[#allocation5 + $0x30] sm:$0xff]  ;;  %s142_s12 = sshll.u32 %s316_s11, 4  ;;  %s143_s12 = int_to_ptr.vmem [resolvable:$true] %s142_s12 }
  0x29   :  { %v212_v10 = vpack.c.bf16 %v47_v9, %v46_v8  ;;  %v49_v12 = vld [vmem:[#allocation5 + $0x38] sm:$0xff]  ;;  %v50_v14 = vld [vmem:[#allocation5 + $0x40] sm:$0xff]  ;;  %v51_v15 = vld [vmem:[#allocation5 + $0x48] sm:$0xff]  ;;  %s281_s13 = scalar_lea.vmem %s143_s12, 64  ;;  %p286_p3 = scmp.lt.s32.totalorder %s143_s12, %s143_s12 }
  0x2a   :  { %207 = vmatpush3.bf16.msra.mxu0 %v206_v5  ;;  %v215_v13 = vpack.c.bf16 %v49_v12, %v48_v11  ;;  %v218_v16 = vpack.c.bf16 %v51_v15, %v50_v14  ;;  %v52_v17 = vld [vmem:[#allocation5 + $0x50] sm:$0xff]  ;;  %v53_v18 = vld [vmem:[#allocation5 + $0x58] sm:$0xff]  ;;  %v54_v20 = vld [vmem:[#allocation5 + $0x60] sm:$0xff]  ;;  %p282_p2 = scmp.ne.s32.totalorder %s143_s12, %s281_s13  ;;  %p287_p4 = scmp.lt.s32.totalorder %s281_s13, %s281_s13 }
  0x2b   :  { %208 = vmatprep.subr.bf16.mxu0 %v313_v0  ;;  %v221_v19 = vpack.c.bf16 %v53_v18, %v52_v17  ;;  %v55_v21 = vld [vmem:[#allocation5 + $0x68] sm:$0xff]  ;;  %v56_v23 = vld [vmem:[#allocation5 + $0x70] sm:$0xff]  ;;  %v57_v24 = vld [vmem:[#allocation5 + $0x78] sm:$0xff] }
  0x2c   :  { %v224_v22 = vpack.c.bf16 %v55_v21, %v54_v20  ;;  %v227_v25 = vpack.c.bf16 %v57_v24, %v56_v23  ;;  %v41_v26 = vld [vmem:[#allocation2] sm:$0xf]  ;;  %p288_p5 = por %p287_p4, %p286_p3 }
  0x2d   :  { %v152_v27 = vld [vmem:[%s385_s2] ss:$0 sm:$0xff] }
  0x2e   :  { %210 = vmatpush3.bf16.msra.mxu0 %v209_v7  ;;  %p289_p6 = pnand %p288_p5, %p282_p2 }
  0x2f   :  { %211 = vmatprep.subr.bf16.mxu0 %v313_v0 }
  0x32   :  { %213 = vmatpush3.bf16.msra.mxu0 %v212_v10 }
  0x33   :  { %214 = vmatprep.subr.bf16.mxu0 %v313_v0 }
  0x36   :  { %216 = vmatpush3.bf16.msra.mxu0 %v215_v13 }
  0x37   :  { %217 = vmatprep.subr.bf16.mxu0 %v313_v0 }
  0x3a   :  { %219 = vmatpush3.bf16.msra.mxu0 %v218_v16 }
  0x3b   :  { %220 = vmatprep.subr.bf16.mxu0 %v313_v0 }
  0x3e   :  { %222 = vmatpush3.bf16.msra.mxu0 %v221_v19 }
  0x3f   :  { %223 = vmatprep.subr.bf16.mxu0 %v313_v0 }
  0x42   :  { %225 = vmatpush3.bf16.msra.mxu0 %v224_v22 }
  0x43   :  { %226 = vmatprep.subr.bf16.mxu0 %v313_v0 }
  0x46   :  { %228 = vmatpush3.bf16.msra.mxu0 %v227_v25 }
  0x49   :  { %203 = vmatmul.mubr.f32.vlgmr.msra.gmra.mrb[0].mxu0 %v41_v26 }
 0x11c   :  { %v131_v28 = vpop.f32.mrb[0].mxu0 }
 0x11d   :  { %v132_v29 = vadd.f32 %v152_v27, %v131_v28  ;;  %v204_v30 = vpop.f32.mrb[1].mxu0 }
 0x11f   :  { %135 = vst [vmem:[#allocation7] sm:$0xf] %v132_v29 }
 0x120   :  { %292 = shalt.err (!%p289_p6)
}
 0x121   :  { %s293_s16 = scalar_lea.hbm %s386_s3, 64 }
 0x122   :  { %p294_p7 = scmp.ne.s32.totalorder %s386_s3, %s293_s16  ;;  %p297_p8 = scmp.lt.u32.totalorder %s293_s16, %s386_s3 }
 0x124   :  { %p299_p9 = pnand %p297_p8, %p294_p7 }
 0x126   :  { %302 = shalt.err (!%p299_p9)
}
 0x127   :  { %145 = dma.vmem_to_hbm [thread:$0]  %s143_s12, 64, %s386_s3, [#allocation4]  }
 0x128   :  { %307 = dma.done.wait [#allocation4], 64  }
 0x129   :  { %308 = vsyncadd [#allocation4], 4294967232 }
 0x12a   :  { %149 = vsyncpa [#allocation3], 1 }
 0x12b   :  { %150 = vsyncpa [#allocation6], 1 }
 0x12c   :  { %151 = vsyncpa [#allocation4], 1 }

</bundles_post_ra>
